<compile_context>
chip_gen: v5e
topology: v5e:2x2
jax: 0.10.0
libtpu: 0.0.40
codegen_flags: <defaults>
</compile_context>

<pallas_src>
import functools

import jax
import jax.numpy as jnp
from jax import lax
from jax.experimental import pallas as pl
from jax.experimental.pallas import tpu as pltpu

_MIB = 1024 * 1024
# Cap for the double-buffered input footprint (2 inputs x 2 pipeline buffers),
# chosen for the smallest-VMEM generation (v7x: 64 MiB physical).
_VMEM_BUDGET = 24 * _MIB
_MAX_ROW_BLK = 1024


def _wpl_kernel(g_ref, e_ref, o_ref, *, t_dim, n_rows, row_blk):
    """One grid step: per-row partial sums of |gaze - mean(gaze_ema)| / std(gaze)."""
    i = pl.program_id(0)

    g = g_ref[...].astype(jnp.float32)  # (row_blk, T)
    e = e_ref[...].astype(jnp.float32)  # (row_blk, T)

    # mean of gaze_ema over time (per row)
    mean_e = jnp.mean(e, axis=1, keepdims=True)                      # (row_blk, 1)
    # unbiased std of gaze over time (per row), matching torch.std default
    mean_g = jnp.mean(g, axis=1, keepdims=True)                      # (row_blk, 1)
    var = jnp.sum((g - mean_g) ** 2, axis=1, keepdims=True) * (1.0 / (t_dim - 1.0))
    inv_std = lax.rsqrt(var)                                          # EUP; no per-element divide

    # Mask rows past the true row count (padded rows have var == 0 -> inf rsqrt).
    row_ids = i * row_blk + lax.broadcasted_iota(jnp.int32, (row_blk, 1), 0)
    inv_std = jnp.where(row_ids < n_rows, inv_std, 0.0)

    # Per-row partial sums; final sum + /N happens in the wrapper.
    o_ref[...] = jnp.sum(jnp.abs(g - mean_e) * inv_std, axis=1, keepdims=True)


def weighted_pseudo_label_loss(gaze, gaze_ema):
    assert gaze.shape == gaze_ema.shape
    B, C, T = gaze.shape
    assert C == 2, "gaze must be (B, 2, T)"
    rows = B * C

    g2 = gaze.reshape(rows, T)
    e2 = gaze_ema.reshape(rows, T)

    itemsize = jnp.dtype(gaze.dtype).itemsize
    # 2 inputs x 2 pipeline buffers x row_blk x T x itemsize <= _VMEM_BUDGET
    max_rows_by_vmem = max(8, (_VMEM_BUDGET // (4 * T * itemsize)) // 8 * 8)
    row_blk = min(_MAX_ROW_BLK, max_rows_by_vmem, ((rows + 7) // 8) * 8)
    row_blk = max(8, (row_blk // 8) * 8)

    num_blocks = pl.cdiv(rows, row_blk)
    rows_padded = num_blocks * row_blk
    if rows_padded != rows:
        pad = ((0, rows_padded - rows), (0, 0))
        g2 = jnp.pad(g2, pad)
        e2 = jnp.pad(e2, pad)

    # Raise the scoped-VMEM limit enough for the double-buffered tiles
    # (need <= 24 MiB by construction; stay well under v7x's 64 MiB physical).
    need = 2 * 2 * row_blk * T * itemsize
    vmem_limit = int(min(max(2 * need, 32 * _MIB), 56 * _MIB))

    # TODO(synk): for very long T, add a second grid axis over T with running
    # (sum, sum_ema, sum_sq) accumulators instead of loading full rows.

    kern = functools.partial(
        _wpl_kernel, t_dim=float(T), n_rows=rows, row_blk=row_blk
    )

    partials = pl.pallas_call(
        kern,
        out_shape=jax.ShapeDtypeStruct((rows_padded, 1), jnp.float32),
        grid_spec=pltpu.PrefetchScalarGridSpec(
            num_scalar_prefetch=0,
            grid=(num_blocks,),
            in_specs=[
                pl.BlockSpec((row_blk, T), lambda i: (i, 0)),
                pl.BlockSpec((row_blk, T), lambda i: (i, 0)),
            ],
            out_specs=pl.BlockSpec((row_blk, 1), lambda i: (i, 0)),
        ),
        compiler_params=pltpu.CompilerParams(
            dimension_semantics=("parallel",),
            vmem_limit_bytes=vmem_limit,
        ),
    )(g2, e2)

    return jnp.sum(partials) / jnp.float32(rows * T)


def _reference(gaze, gaze_ema):
    # Pure-JAX reference mirroring the PyTorch code (unbiased std).
    T = gaze.shape[2]
    mean_e = jnp.mean(gaze_ema, axis=2, keepdims=True)
    mean_g = jnp.mean(gaze, axis=2, keepdims=True)
    std = jnp.sqrt(jnp.sum((gaze - mean_g) ** 2, axis=2, keepdims=True) / (T - 1))
    return jnp.mean(jnp.abs(gaze - mean_e) / std)


if __name__ == "__main__":
    key = jax.random.PRNGKey(0)
    # (aligned rows case) and (ragged rows + non-128-multiple T case, exercises masking)
    cases = [(4, 2, 128), (5, 2, 100)]
    ok = True
    for idx, (B, C, T) in enumerate(cases):
        k1, k2 = jax.random.split(jax.random.fold_in(key, idx))
        gaze = jax.random.normal(k1, (B, C, T), dtype=jnp.float32)
        gaze_ema = jax.random.normal(k2, (B, C, T), dtype=jnp.float32)

        loss = jax.block_until_ready(weighted_pseudo_label_loss(gaze, gaze_ema))
        ref = jax.block_until_ready(_reference(gaze, gaze_ema))
        ok = ok and bool(jnp.allclose(loss, ref, rtol=1e-5, atol=1e-5))

    assert ok
    print("KERNEL_OK")
</pallas_src>

<mosaic_0001>
module attributes {stable_mosaic.version = 11 : i64} {
  func.func @_wpl_kernel(%arg0: i32, %arg1: memref<8x128xf32, #tpu.memory_space<vmem>>, %arg2: memref<8x128xf32, #tpu.memory_space<vmem>>, %arg3: memref<8x1xf32, #tpu.memory_space<vmem>>) attributes {dimension_semantics = [#tpu.dimension_semantics<parallel>], iteration_bounds = array<i64: 1>, scalar_prefetch = 0 : i64, scratch_operands = 0 : i64, tpu.core_type = #tpu.core_type<tc>, window_params = [{transform_indices = @transform_0, window_bounds = array<i64: 8, 128>}, {transform_indices = @transform_1, window_bounds = array<i64: 8, 128>}, {transform_indices = @transform_2, window_bounds = array<i64: 8, 1>}]} {
    %c0 = arith.constant 0 : index
    %c0_0 = arith.constant 0 : index
    %0 = vector.load %arg1[%c0, %c0_0] : memref<8x128xf32, #tpu.memory_space<vmem>>, vector<8x128xf32>
    %c0_1 = arith.constant 0 : index
    %c0_2 = arith.constant 0 : index
    %1 = vector.load %arg2[%c0_1, %c0_2] : memref<8x128xf32, #tpu.memory_space<vmem>>, vector<8x128xf32>
    %cst = arith.constant dense<0.000000e+00> : vector<8xf32>
    %2 = vector.multi_reduction <add>, %1, %cst [1] : vector<8x128xf32> to vector<8xf32>
    %3 = vector.shape_cast %2 : vector<8xf32> to vector<8x1xf32>
    %cst_3 = arith.constant 1.280000e+02 : f32
    %4 = vector.broadcast %cst_3 : f32 to vector<8x1xf32>
    %5 = arith.divf %3, %4 : vector<8x1xf32>
    %cst_4 = arith.constant dense<0.000000e+00> : vector<8xf32>
    %6 = vector.multi_reduction <add>, %0, %cst_4 [1] : vector<8x128xf32> to vector<8xf32>
    %7 = vector.shape_cast %6 : vector<8xf32> to vector<8x1xf32>
    %cst_5 = arith.constant 1.280000e+02 : f32
    %8 = vector.broadcast %cst_5 : f32 to vector<8x1xf32>
    %9 = arith.divf %7, %8 : vector<8x1xf32>
    %10 = vector.broadcast %9 : vector<8x1xf32> to vector<8x128xf32>
    %11 = arith.subf %0, %10 : vector<8x128xf32>
    %12 = arith.mulf %11, %11 : vector<8x128xf32>
    %cst_6 = arith.constant dense<0.000000e+00> : vector<8xf32>
    %13 = vector.multi_reduction <add>, %12, %cst_6 [1] : vector<8x128xf32> to vector<8xf32>
    %14 = vector.shape_cast %13 : vector<8xf32> to vector<8x1xf32>
    %cst_7 = arith.constant 0.00787401571 : f32
    %15 = vector.broadcast %cst_7 : f32 to vector<8x1xf32>
    %16 = arith.mulf %14, %15 : vector<8x1xf32>
    %17 = math.rsqrt %16 : vector<8x1xf32>
    %c8_i32 = arith.constant 8 : i32
    %18 = arith.muli %arg0, %c8_i32 : i32
    %19 = tpu.iota {dimensions = array<i32: 0>} : vector<8x1xi32>
    %20 = vector.broadcast %18 : i32 to vector<8x1xi32>
    %21 = arith.addi %20, %19 : vector<8x1xi32>
    %c8_i32_8 = arith.constant 8 : i32
    %22 = vector.broadcast %c8_i32_8 : i32 to vector<8x1xi32>
    %23 = arith.cmpi slt, %21, %22 : vector<8x1xi32>
    %cst_9 = arith.constant 0.000000e+00 : f32
    %24 = vector.broadcast %cst_9 : f32 to vector<8x1xf32>
    %25 = arith.select %23, %17, %24 : vector<8x1xi1>, vector<8x1xf32>
    %26 = vector.broadcast %5 : vector<8x1xf32> to vector<8x128xf32>
    %27 = arith.subf %0, %26 : vector<8x128xf32>
    %28 = math.absf %27 : vector<8x128xf32>
    %29 = vector.broadcast %25 : vector<8x1xf32> to vector<8x128xf32>
    %30 = arith.mulf %28, %29 : vector<8x128xf32>
    %cst_10 = arith.constant dense<0.000000e+00> : vector<8xf32>
    %31 = vector.multi_reduction <add>, %30, %cst_10 [1] : vector<8x128xf32> to vector<8xf32>
    %32 = vector.shape_cast %31 : vector<8xf32> to vector<8x1xf32>
    %c0_11 = arith.constant 0 : index
    %c0_12 = arith.constant 0 : index
    %33 = vector.load %arg3[%c0_11, %c0_12] : memref<8x1xf32, #tpu.memory_space<vmem>>, vector<8x1xf32>
    tpu.vector_store %arg3[%c0_11, %c0_12], %32 {strides = array<i32>} : memref<8x1xf32, #tpu.memory_space<vmem>>, vector<8x1xf32>,
    return
  }
  func.func @transform_0(%arg0: i32) -> (i32, i32) {
    %c0_i32 = arith.constant 0 : i32
    %c0_i32_0 = arith.constant 0 : i32
    return %arg0, %c0_i32 : i32, i32
  }
  func.func @transform_1(%arg0: i32) -> (i32, i32) {
    %c0_i32 = arith.constant 0 : i32
    %c0_i32_0 = arith.constant 0 : i32
    return %arg0, %c0_i32 : i32, i32
  }
  func.func @transform_2(%arg0: i32) -> (i32, i32) {
    %c0_i32 = arith.constant 0 : i32
    %c0_i32_0 = arith.constant 0 : i32
    return %arg0, %c0_i32 : i32, i32
  }
}

</mosaic_0001>

<bundles_post_ra>
// kernel: tpu_custom_call.1
= control target key start
LH: loop header
LB: loop body
LE: loop exit
PB: predicated region body
PF: predicated region fallthrough
CT: control target
= control target key end

     0   :  { %7 = vsyncpa [#allocation3], 0  ;;  %s175_s0 = inlined_call_operand.hbm [shape: f32[8,128], index: 0, kind: input, shape index: {}]   ;;  %s176_s1 = inlined_call_operand.hbm [shape: f32[8,128], index: 1, kind: input, shape index: {}]   ;;  %s177_s2 = inlined_call_operand.vmem [shape: f32[8,1], index: 2, kind: output, shape index: {}]  }
   0x1   :  { %s14_s11 = sshll.u32 %s175_s0, 4  ;;  %s15_s11 = int_to_ptr.hbm [resolvable:$true] %s14_s11 }
   0x2   :  { %8 = vsyncpa [#allocation5], 0  ;;  %s148_s12 = smov [#allocation2]   ;;  %s25_s16 = sshll.u32 %s176_s1, 4  ;;  %s26_s16 = int_to_ptr.hbm [resolvable:$true] %s25_s16 }
   0x3   :  { %s16_s13 = sshll.u32 %s148_s12, 4  ;;  %s149_s17 = smov [#allocation4]   ;;  %s17_s13 = int_to_ptr.vmem [resolvable:$true] %s16_s13 }
   0x4   :  { %19 = dma.hbm_to_vmem [thread:$0]  %s15_s11, 128, %s17_s13, [#allocation3]  }
   0x5   :  { %s27_s18 = sshll.u32 %s149_s17, 4  ;;  %s28_s18 = int_to_ptr.vmem [resolvable:$true] %s27_s18 }
   0x6   :  { %30 = dma.hbm_to_vmem [thread:$0]  %s26_s16, 128, %s28_s18, [#allocation5]  }
   0x7   :  { %144 = dma.done.wait [#allocation3], 128  }
   0x8   :  { %145 = vsyncadd [#allocation3], 4294967168 }
   0x9   :  { %146 = dma.done.wait [#allocation5], 128  }
   0xa   :  { %147 = vsyncadd [#allocation5], 4294967168  ;;  %v39_v0 = vld [vmem:[#allocation2] sm:$0xff]  ;;  %v150_v1 = vmov 128.0   ;;  %v40_v2 = vld [vmem:[#allocation4] sm:$0xff]  ;;  %vm81_vm4 = vcmask 7168  }
   0xb   :  { %51 = vadd.xlane.f32.xlu0 %v39_v0  ;;  %92 = vrcp.f32 %v150_v1  ;;  %41 = vadd.xlane.f32.xlu1 %v40_v2 }
  0x11   :  { %v93_v3 = vpop.eup %92 }
  0x12   :  { %v44_v4 = vmul.f32 128.0, %v93_v3  ;;  %vm48_vm0 = vweird.f32 %v93_v3 }
  0x14   :  { %v45_v5 = vsub.f32 1.0, %v44_v4 }
  0x16   :  { %v46_v6 = vmul.f32 %v93_v3, %v45_v5 }
  0x18   :  { %v47_v7 = vadd.f32 %v93_v3, %v46_v6 }
  0x1a   :  { %v49_v8 = vsel %vm48_vm0, %v93_v3, %v47_v7 }
  0x7e   :  { %v52_v9 = vpop.xlane.xlu0 %51  ;;  %v42_v15 = vpop.xlane.xlu1 %41 }
  0x7f   :  { %v53_v10 = vmul.f32 %v52_v9, %v49_v8  ;;  %v50_v17 = vmul.f32 %v49_v8, %v42_v15 }
  0x81   :  { %v54_v11 = vsub.f32 %v39_v0, %v53_v10  ;;  %v76_v20 = vsub.f32 %v39_v0, %v50_v17 }
  0x83   :  { %v55_v12 = vmul.f32 %v54_v11, %v54_v11  ;;  %v77_v23 = vand.u32 2147483647, %v76_v20 }
  0x85   :  { %56 = vadd.xlane.f32.xlu0 %v55_v12 }
  0xf8   :  { %v57_v13 = vpop.xlane.xlu0 %56 }
  0xf9   :  { %v58_v14 = vmul.f32 0.007874016, %v57_v13 }
  0xfb   :  { %94 = vrsqrt.f32 %v58_v14  ;;  %vm65_vm2 = vweird.f32 %v58_v14 }
 0x101   :  { %v95_v16 = vpop.eup %94 }
 0x102   :  { %v60_v18 = vmul.f32 %v95_v16, %v58_v14  ;;  %vm66_vm1 = vweird.f32 %v95_v16 }
 0x103   :  { %vm67_vm3 = vmor %vm65_vm2, %vm66_vm1 }
 0x104   :  { %v61_v19 = vmul.f32 %v95_v16, %v60_v18 }
 0x106   :  { %v62_v21 = vmul.f32 0.5, %v61_v19 }
 0x108   :  { %v63_v22 = vsub.f32 1.5, %v62_v21 }
 0x10a   :  { %v64_v24 = vmul.f32 %v95_v16, %v63_v22 }
 0x10c   :  { %v68_v25 = vsel %vm67_vm3, %v95_v16, %v64_v24 }
 0x10d   :  { %v78_v26 = vmul.f32 %v77_v23, %v68_v25 }
 0x10f   :  { %79 = vadd.xlane.f32.xlu1 %v78_v26 }
 0x182   :  { %v80_v27 = vpop.xlane.xlu1 %79 }
 0x183   :  { %82 = vst.msk [vmem:[%s177_s2] sm:$0xff] %vm81_vm4, %v80_v27 }
 0x184   :  { %87 = vsyncpa [#allocation3], 1 }
 0x185   :  { %88 = vsyncpa [#allocation5], 1 }

</bundles_post_ra>
